<compile_context>
chip_gen: v5e
topology: v5e:2x2
jax: 0.10.0
libtpu: 0.0.40
codegen_flags: <defaults>
</compile_context>

<pallas_src>
import jax
import jax.numpy as jnp
from jax.experimental import pallas as pl
from jax.experimental.pallas import tpu as pltpu

LANE = 128
_WEIGHT_VMEM_BUDGET = 16 << 20   # resident weight blocks (incl. double-buffering)
_TILE_VMEM_BUDGET = 24 << 20     # per-batch-tile activations (x/out/h/acc, incl. buffers)


def _round_up(x, m):
    return ((x + m - 1) // m) * m


def mlp_kernel(x_ref, w1_ref, b1_ref, w2_ref, b2_ref, o_ref, acc_ref):
    """grid = (batch tiles, hidden tiles). Hidden axis is a reduction:
    the output block index is constant across it and acc_ref accumulates."""
    h_idx = pl.program_id(1)

    @pl.when(h_idx == 0)
    def _():
        acc_ref[...] = jnp.zeros_like(acc_ref)

    # hidden tile = relu(x @ W1[:, h_tile] + b1[h_tile]); bf16 MXU, f32 accumulate,
    # bias + ReLU in f32 on the VPU.
    h = jnp.dot(x_ref[...], w1_ref[...], preferred_element_type=jnp.float32)
    h = jnp.maximum(h + b1_ref[...], 0.0)
    # Partial second matmul over this hidden tile, accumulated in f32.
    acc_ref[...] += jnp.dot(h.astype(jnp.bfloat16), w2_ref[...],
                            preferred_element_type=jnp.float32)

    @pl.when(h_idx == pl.num_programs(1) - 1)
    def _():
        o_ref[...] = (acc_ref[...] + b2_ref[...]).astype(o_ref.dtype)


def _choose_tile_h(Fp, Hp, Op):
    """Largest hidden tile whose bf16 weight blocks fit the weight VMEM budget."""
    if (Fp + Op) * Hp * 2 <= _WEIGHT_VMEM_BUDGET:
        return Hp                                   # whole H resident -> grid_h == 1
    # Tiled H: weight blocks are double-buffered, keep the pair under budget.
    tile_h = (_WEIGHT_VMEM_BUDGET // (2 * (Fp + Op) * 2)) // LANE * LANE
    return max(LANE, min(tile_h, Hp))


def _choose_tile_m(B, Fp, tile_h, Op, out_bytes):
    """Biggest batch tile that fits the activation VMEM budget; keep >= 2 grid
    steps when B is big enough so v7x can shard the parallel axis across TCs."""
    if B < 256:
        if B >= 32:
            # Two 16-aligned tiles so the second v7x TensorCore isn't idle.
            return max(16, _round_up((B + 1) // 2, 16))
        return max(16, _round_up(B, 16))            # bf16 native sublane tile is 16
    per_row = (2 * Fp * 2            # x bf16, double-buffered
               + 2 * Op * out_bytes  # out, double-buffered
               + Op * 4              # f32 accumulator scratch
               + tile_h * 4)         # f32 hidden intermediate
    cap = max(128, (_TILE_VMEM_BUDGET // per_row) // 128 * 128)
    half_b = max(128, (_round_up(B, 128) // 2) // 128 * 128)   # ensure grid_m >= 2
    return min(2048, cap, half_b)


def prepare_standard_net_params(w1, b1, w2, b2):
    """One-time parameter prep (hoisted out of the forward path).

    w1: (H, F), b1: (H,), w2: (O, H), b2: (O,)  -- PyTorch nn.Linear layout.
    Transposes weights to (in, out), zero-pads feature dims to multiples of 128
    (and H to a multiple of the chosen hidden tile) and casts matmul operands
    to bf16. Zero padding is numerically exact: padded rows/cols contribute
    nothing and padded biases are zero (ReLU(0) = 0 feeds zero weight columns).
    """
    H, F = w1.shape
    O = w2.shape[0]
    Fp, Op = _round_up(F, LANE), _round_up(O, LANE)
    Hp = _round_up(H, LANE)
    tile_h = _choose_tile_h(Fp, Hp, Op)
    Hp = _round_up(Hp, tile_h)                      # tile_h divides Hp exactly

    w1_t = jnp.zeros((Fp, Hp), jnp.float32).at[:F, :H].set(
        jnp.asarray(w1, jnp.float32).T)
    w2_t = jnp.zeros((Hp, Op), jnp.float32).at[:H, :O].set(
        jnp.asarray(w2, jnp.float32).T)
    b1_p = jnp.zeros((1, Hp), jnp.float32).at[0, :H].set(
        jnp.asarray(b1, jnp.float32))
    b2_p = jnp.zeros((1, Op), jnp.float32).at[0, :O].set(
        jnp.asarray(b2, jnp.float32))

    return {
        "w1": w1_t.astype(jnp.bfloat16),
        "b1": b1_p,
        "w2": w2_t.astype(jnp.bfloat16),
        "b2": b2_p,
        "dims": (F, H, O, Fp, Hp, Op, tile_h),
    }


def standard_net_forward(x, params, *, tile_m=None, out_dtype=jnp.float32,
                         slice_output=True):
    """x: (B, F) float.  params: output of prepare_standard_net_params.

    out_dtype=jnp.bfloat16 halves the output HBM writeback (the dominant
    steady-state traffic) if the consumer tolerates it.
    slice_output=False returns the padded (Bp, Op) slab, avoiding a second
    HBM pass when O is tiny (consumer can slice lazily). Padded rows/lanes of
    the slab are NOT meaningful (pad rows contain relu(b1) @ W2 + b2).
    """
    F, H, O, Fp, Hp, Op, tile_h = params["dims"]
    B = x.shape[0]
    out_bytes = jnp.dtype(out_dtype).itemsize

    if tile_m is None:
        tile_m = _choose_tile_m(B, Fp, tile_h, Op, out_bytes)
    Bp = _round_up(B, tile_m)
    grid_m = Bp // tile_m
    grid_h = Hp // tile_h

    # Build the padded input directly in bf16 (no f32 intermediate pass);
    # skip the pad entirely when already aligned.
    x_bf = jnp.asarray(x, jnp.bfloat16)
    if (B, F) == (Bp, Fp):
        x_p = x_bf
    else:
        x_p = jnp.zeros((Bp, Fp), jnp.bfloat16).at[:B, :F].set(x_bf)

    # Grid-invariant blocks (grid_h == 1) are single-buffered to halve their
    # VMEM footprint; when H is tiled they keep default double-buffering so
    # the next hidden tile's weights prefetch behind the current matmuls.
    if grid_h == 1:
        def wspec(shape, imap):
            return pl.BlockSpec(shape, imap, pipeline_mode=pl.Buffered(1))
    else:
        def wspec(shape, imap):
            return pl.BlockSpec(shape, imap)

    # Explicit VMEM limit sized from the actual footprint (headroom included),
    # capped below v7x's 64 MiB physical ceiling.
    w_bufs = 1 if grid_h == 1 else 2
    vmem_needed = (w_bufs * (tile_h * (Fp + Op) * 2 + tile_h * 4)  # w1,w2,b1 blocks
                   + Op * 4                                        # b2 block
                   + 2 * tile_m * Fp * 2                           # x tiles (2 bufs)
                   + 2 * tile_m * Op * out_bytes                   # out tiles (2 bufs)
                   + tile_m * Op * 4                               # f32 acc scratch
                   + tile_m * tile_h * 4)                          # f32 hidden temp
    vmem_limit = min(max(int(vmem_needed * 1.5) + (4 << 20), 32 << 20), 56 << 20)

    flops = 2 * Bp * Hp * (Fp + Op)
    bytes_accessed = (x_p.size * 2
                      + params["w1"].size * 2 + params["w2"].size * 2
                      + params["b1"].size * 4 + params["b2"].size * 4
                      + Bp * Op * out_bytes)

    out_p = pl.pallas_call(
        mlp_kernel,
        out_shape=jax.ShapeDtypeStruct((Bp, Op), out_dtype),
        grid_spec=pltpu.PrefetchScalarGridSpec(
            num_scalar_prefetch=0,
            grid=(grid_m, grid_h),                  # reduction axis (H) last
            in_specs=[
                # x tile marches over the batch, constant across the H axis.
                pl.BlockSpec((tile_m, Fp), lambda i, h: (i, 0)),
                # Weight / bias tiles march over H (or stay resident if grid_h==1).
                wspec((Fp, tile_h), lambda i, h: (0, h)),
                wspec((1, tile_h), lambda i, h: (0, h)),
                wspec((tile_h, Op), lambda i, h: (h, 0)),
                pl.BlockSpec((1, Op), lambda i, h: (0, 0),
                             pipeline_mode=pl.Buffered(1)),
            ],
            out_specs=pl.BlockSpec((tile_m, Op), lambda i, h: (i, 0)),
            scratch_shapes=[pltpu.VMEM((tile_m, Op), jnp.float32)],
        ),
        compiler_params=pltpu.CompilerParams(
            dimension_semantics=("parallel", "arbitrary"),
            vmem_limit_bytes=vmem_limit),
        cost_estimate=pl.CostEstimate(flops=flops, transcendentals=0,
                                      bytes_accessed=bytes_accessed),
    )(x_p, params["w1"], params["b1"], params["w2"], params["b2"])

    if not slice_output or (B == Bp and O == Op):
        return out_p
    # TODO(synk): for tiny O consider slice_output=False to skip this extra
    # HBM pass and slice lazily at the consumer.
    return out_p[:B, :O]


def standard_net_reference(x, w1, b1, w2, b2):
    h = jnp.maximum(x @ w1.T + b1, 0.0)
    return h @ w2.T + b2


if __name__ == "__main__":
    # Small shapes consistent with StandardNet(n_feature, n_hidden, n_output).
    B, n_feature, n_hidden, n_output = 16, 16, 32, 4

    key = jax.random.PRNGKey(0)
    kx, k1, kb1, k2, kb2 = jax.random.split(key, 5)

    x = jax.random.normal(kx, (B, n_feature), dtype=jnp.float32)
    # Synthetic parameters in PyTorch nn.Linear layout (out, in).
    w1 = jax.random.normal(k1, (n_hidden, n_feature), dtype=jnp.float32) * 0.1
    b1 = jax.random.normal(kb1, (n_hidden,), dtype=jnp.float32) * 0.1
    w2 = jax.random.normal(k2, (n_output, n_hidden), dtype=jnp.float32) * 0.1
    b2 = jax.random.normal(kb2, (n_output,), dtype=jnp.float32) * 0.1

    params = prepare_standard_net_params(w1, b1, w2, b2)  # one-time prep
    ref = standard_net_reference(x, w1, b1, w2, b2)

    # f32 output (default).
    out = jax.block_until_ready(standard_net_forward(x, params))
    assert out.shape == (B, n_output)
    max_err = float(jnp.max(jnp.abs(out - ref)))
    # bf16 matmul inputs with f32 accumulation -> loose-ish tolerance vs f32 ref.
    assert jnp.allclose(out, ref, atol=3e-2, rtol=3e-2), f"mismatch(f32): {max_err}"

    # bf16 output path (halved writeback traffic on the mem-bound kernel).
    out_bf = jax.block_until_ready(
        standard_net_forward(x, params, out_dtype=jnp.bfloat16))
    assert out_bf.shape == (B, n_output)
    max_err_bf = float(jnp.max(jnp.abs(out_bf.astype(jnp.float32) - ref)))
    assert jnp.allclose(out_bf.astype(jnp.float32), ref, atol=5e-2, rtol=5e-2), \
        f"mismatch(bf16): {max_err_bf}"

    print("KERNEL_OK")
</pallas_src>

<mosaic_0001>
module attributes {stable_mosaic.version = 11 : i64} {
  func.func @mlp_kernel(%arg0: i32, %arg1: i32, %arg2: memref<16x128xbf16, #tpu.memory_space<vmem>>, %arg3: memref<128x128xbf16, #tpu.memory_space<vmem>>, %arg4: memref<1x128xf32, #tpu.memory_space<vmem>>, %arg5: memref<128x128xbf16, #tpu.memory_space<vmem>>, %arg6: memref<1x128xf32, #tpu.memory_space<vmem>>, %arg7: memref<16x128xf32, #tpu.memory_space<vmem>>, %arg8: memref<16x128xf32, #tpu.memory_space<vmem>>) attributes {dimension_semantics = [#tpu.dimension_semantics<parallel>, #tpu.dimension_semantics<arbitrary>], iteration_bounds = array<i64: 1, 1>, scalar_prefetch = 0 : i64, scratch_operands = 1 : i64, tpu.core_type = #tpu.core_type<tc>, window_params = [{transform_indices = @transform_0, window_bounds = array<i64: 16, 128>}, {pipeline_mode = #tpu.pipeline_mode<synchronous>, transform_indices = @transform_1, window_bounds = array<i64: 128, 128>}, {pipeline_mode = #tpu.pipeline_mode<synchronous>, transform_indices = @transform_2, window_bounds = array<i64: 1, 128>}, {pipeline_mode = #tpu.pipeline_mode<synchronous>, transform_indices = @transform_3, window_bounds = array<i64: 128, 128>}, {pipeline_mode = #tpu.pipeline_mode<synchronous>, transform_indices = @transform_4, window_bounds = array<i64: 1, 128>}, {transform_indices = @transform_5, window_bounds = array<i64: 16, 128>}]} {
    %c0_i32 = arith.constant 0 : i32
    %0 = arith.cmpi eq, %arg1, %c0_i32 : i32
    %1 = arith.extui %0 : i1 to i32
    %c0_i32_0 = arith.constant 0 : i32
    %2 = arith.cmpi ne, %1, %c0_i32_0 : i32
    scf.if %2 {
      %cst_16 = arith.constant 0.000000e+00 : f32
      %20 = vector.broadcast %cst_16 : f32 to vector<16x128xf32>
      %c0_17 = arith.constant 0 : index
      %c0_18 = arith.constant 0 : index
      %21 = vector.load %arg8[%c0_17, %c0_18] : memref<16x128xf32, #tpu.memory_space<vmem>>, vector<16x128xf32>
      tpu.vector_store %arg8[%c0_17, %c0_18], %20 {strides = array<i32>} : memref<16x128xf32, #tpu.memory_space<vmem>>, vector<16x128xf32>,
    } else {
    }
    %c0 = arith.constant 0 : index
    %c0_1 = arith.constant 0 : index
    %3 = vector.load %arg2[%c0, %c0_1] : memref<16x128xbf16, #tpu.memory_space<vmem>>, vector<16x128xbf16>
    %c0_2 = arith.constant 0 : index
    %c0_3 = arith.constant 0 : index
    %4 = vector.load %arg3[%c0_2, %c0_3] : memref<128x128xbf16, #tpu.memory_space<vmem>>, vector<128x128xbf16>
    %cst = arith.constant dense<0.000000e+00> : vector<16x128xf32>
    %5 = tpu.matmul %3, %4, %cst {dimension_numbers = #tpu.dot_dimension_numbers<[1], [0], [0], [1], [0, 0, 1, 1], [], []>} : vector<16x128xbf16>, vector<128x128xbf16>, vector<16x128xf32> -> vector<16x128xf32>
    %c0_4 = arith.constant 0 : index
    %c0_5 = arith.constant 0 : index
    %6 = vector.load %arg4[%c0_4, %c0_5] : memref<1x128xf32, #tpu.memory_space<vmem>>, vector<1x128xf32>
    %7 = vector.broadcast %6 : vector<1x128xf32> to vector<16x128xf32>
    %8 = arith.addf %5, %7 : vector<16x128xf32>
    %cst_6 = arith.constant 0.000000e+00 : f32
    %9 = vector.broadcast %cst_6 : f32 to vector<16x128xf32>
    %10 = arith.maximumf %8, %9 : vector<16x128xf32>
    %c0_7 = arith.constant 0 : index
    %c0_8 = arith.constant 0 : index
    %11 = vector.load %arg8[%c0_7, %c0_8] : memref<16x128xf32, #tpu.memory_space<vmem>>, vector<16x128xf32>
    %12 = arith.truncf %10 : vector<16x128xf32> to vector<16x128xbf16>
    %c0_9 = arith.constant 0 : index
    %c0_10 = arith.constant 0 : index
    %13 = vector.load %arg5[%c0_9, %c0_10] : memref<128x128xbf16, #tpu.memory_space<vmem>>, vector<128x128xbf16>
    %cst_11 = arith.constant dense<0.000000e+00> : vector<16x128xf32>
    %14 = tpu.matmul %12, %13, %cst_11 {dimension_numbers = #tpu.dot_dimension_numbers<[1], [0], [0], [1], [0, 0, 1, 1], [], []>} : vector<16x128xbf16>, vector<128x128xbf16>, vector<16x128xf32> -> vector<16x128xf32>
    %15 = arith.addf %11, %14 : vector<16x128xf32>
    %c0_12 = arith.constant 0 : index
    %c0_13 = arith.constant 0 : index
    %16 = vector.load %arg8[%c0_12, %c0_13] : memref<16x128xf32, #tpu.memory_space<vmem>>, vector<16x128xf32>
    tpu.vector_store %arg8[%c0_12, %c0_13], %15 {strides = array<i32>} : memref<16x128xf32, #tpu.memory_space<vmem>>, vector<16x128xf32>,
    %c0_i32_14 = arith.constant 0 : i32
    %17 = arith.cmpi eq, %arg1, %c0_i32_14 : i32
    %18 = arith.extui %17 : i1 to i32
    %c0_i32_15 = arith.constant 0 : i32
    %19 = arith.cmpi ne, %18, %c0_i32_15 : i32
    scf.if %19 {
      %c0_16 = arith.constant 0 : index
      %c0_17 = arith.constant 0 : index
      %20 = vector.load %arg8[%c0_16, %c0_17] : memref<16x128xf32, #tpu.memory_space<vmem>>, vector<16x128xf32>
      %c0_18 = arith.constant 0 : index
      %c0_19 = arith.constant 0 : index
      %21 = vector.load %arg6[%c0_18, %c0_19] : memref<1x128xf32, #tpu.memory_space<vmem>>, vector<1x128xf32>
      %22 = vector.broadcast %21 : vector<1x128xf32> to vector<16x128xf32>
      %23 = arith.addf %20, %22 : vector<16x128xf32>
      %c0_20 = arith.constant 0 : index
      %c0_21 = arith.constant 0 : index
      %24 = vector.load %arg7[%c0_20, %c0_21] : memref<16x128xf32, #tpu.memory_space<vmem>>, vector<16x128xf32>
      tpu.vector_store %arg7[%c0_20, %c0_21], %23 {strides = array<i32>} : memref<16x128xf32, #tpu.memory_space<vmem>>, vector<16x128xf32>,
    } else {
    }
    return
  }
  func.func @transform_0(%arg0: i32, %arg1: i32) -> (i32, i32) {
    %c0_i32 = arith.constant 0 : i32
    %c0_i32_0 = arith.constant 0 : i32
    return %arg0, %c0_i32 : i32, i32
  }
  func.func @transform_1(%arg0: i32, %arg1: i32) -> (i32, i32) {
    %c0_i32 = arith.constant 0 : i32
    %c0_i32_0 = arith.constant 0 : i32
    return %c0_i32, %arg1 : i32, i32
  }
  func.func @transform_2(%arg0: i32, %arg1: i32) -> (i32, i32) {
    %c0_i32 = arith.constant 0 : i32
    %c0_i32_0 = arith.constant 0 : i32
    return %c0_i32, %arg1 : i32, i32
  }
  func.func @transform_3(%arg0: i32, %arg1: i32) -> (i32, i32) {
    %c0_i32 = arith.constant 0 : i32
    %c0_i32_0 = arith.constant 0 : i32
    return %arg1, %c0_i32 : i32, i32
  }
  func.func @transform_4(%arg0: i32, %arg1: i32) -> (i32, i32) {
    %c0_i32 = arith.constant 0 : i32
    %c0_i32_0 = arith.constant 0 : i32
    %c0_i32_1 = arith.constant 0 : i32
    return %c0_i32, %c0_i32_0 : i32, i32
  }
  func.func @transform_5(%arg0: i32, %arg1: i32) -> (i32, i32) {
    %c0_i32 = arith.constant 0 : i32
    %c0_i32_0 = arith.constant 0 : i32
    return %arg0, %c0_i32 : i32, i32
  }
}

</mosaic_0001>

<bundles_post_ra>
// kernel: tpu_custom_call.1
= control target key start
LH: loop header
LB: loop body
LE: loop exit
PB: predicated region body
PF: predicated region fallthrough
CT: control target
= control target key end

     0   :  { %10 = vsyncpa [#allocation4], 0  ;;  %s537_s0 = inlined_call_operand.hbm [shape: bf16[16,128], index: 0, kind: input, shape index: {}]   ;;  %s538_s1 = inlined_call_operand.hbm [shape: bf16[128,128], index: 1, kind: input, shape index: {}]   ;;  %s539_s2 = inlined_call_operand.vmem [shape: f32[1,128], index: 2, kind: input, shape index: {}]   ;;  %s540_s3 = inlined_call_operand.hbm [shape: bf16[128,128], index: 3, kind: input, shape index: {}]   ;;  %s541_s4 = inlined_call_operand.vmem [shape: f32[1,128], index: 4, kind: input, shape index: {}]   ;;  %s542_s5 = inlined_call_operand.hbm [shape: f32[16,128], index: 5, kind: output, shape index: {}]  }
   0x1   :  { %11 = vsyncpa [#allocation7], 0 }
   0x2   :  { %12 = vsyncpa [#allocation5], 0  ;;  %s30_s20 = sshll.u32 %s538_s1, 4  ;;  %s481_s21 = smov [#allocation6]   ;;  %s31_s20 = int_to_ptr.hbm [resolvable:$true] %s30_s20 }
   0x3   :  { %s32_s22 = sshll.u32 %s481_s21, 4  ;;  %s17_s25 = sshll.u32 %s537_s0, 4  ;;  %s33_s22 = int_to_ptr.vmem [resolvable:$true] %s32_s22  ;;  %s18_s25 = int_to_ptr.hbm [resolvable:$true] %s17_s25 }
   0x4   :  { %s482_s26 = smov 64   ;;  %s483_s27 = smov 4  }
   0x5   :  { %38 = dma.hbm_to_vmem [thread:$0]  %s31_s20, 1024, %s33_s22, [#allocation7], %s482_s26, %s482_s26, %s483_s27  }
   0x6   :  { %s484_s28 = smov [#allocation3]   ;;  %s45_s7 = sshll.u32 %s540_s3, 4  ;;  %s46_s7 = int_to_ptr.hbm [resolvable:$true] %s45_s7 }
   0x7   :  { %s19_s29 = sshll.u32 %s484_s28, 4  ;;  %s485_s1 = smov [#allocation8]   ;;  %s20_s29 = int_to_ptr.vmem [resolvable:$true] %s19_s29 }
   0x8   :  { %25 = dma.hbm_to_vmem [thread:$0]  %s18_s25, 128, %s20_s29, [#allocation4], %s482_s26, %s482_s26, %s483_s27  }
   0x9   :  { %s47_s8 = sshll.u32 %s485_s1, 4  ;;  %s48_s8 = int_to_ptr.vmem [resolvable:$true] %s47_s8 }
   0xa   :  { %53 = dma.hbm_to_vmem [thread:$0]  %s46_s7, 1024, %s48_s8, [#allocation7], %s482_s26, %s482_s26, %s483_s27  }
   0xb   :  { %475 = dma.done.wait [#allocation4], 128  }
   0xc   :  { %476 = vsyncadd [#allocation4], 4294967168 }
   0xd   :  { %477 = dma.done.wait [#allocation7], 2048  }
   0xe   :  { %478 = vsyncadd [#allocation7], 4294965248  ;;  %v360_v0 = vld [vmem:[#allocation6 + $0x38] sm:$0xff]  ;;  %v359_v1 = vld [vmem:[#allocation6 + $0x30] sm:$0xff]  ;;  %s486_s11 = smov [#allocation9]   ;;  %s487_s15 = smov 128  }
   0xf   :  { %150 = vmatpush.bf16.msra.mxu0 %v360_v0  ;;  %v368_v2 = vld [vmem:[#allocation8 + $0x38] sm:$0xff]  ;;  %v367_v3 = vld [vmem:[#allocation8 + $0x30] sm:$0xff]  ;;  %v358_v4 = vld [vmem:[#allocation6 + $0x28] sm:$0xff]  ;;  %s268_s12 = sshll.u32 %s486_s11, 4  ;;  %s488_s16 = smov 8   ;;  %s269_s12 = int_to_ptr.vmem [resolvable:$true] %s268_s12 }
  0x10   :  { %233 = vmatpush.bf16.msra.mxu1 %v368_v2  ;;  %v366_v5 = vld [vmem:[#allocation8 + $0x28] sm:$0xff]  ;;  %v357_v6 = vld [vmem:[#allocation6 + $0x20] sm:$0xff]  ;;  %v356_v8 = vld [vmem:[#allocation6 + $0x18] sm:$0xff] }
  0x11   :  { %v365_v7 = vld [vmem:[#allocation8 + $0x20] sm:$0xff]  ;;  %v355_v9 = vld [vmem:[#allocation6 + $0x10] sm:$0xff]  ;;  %v354_v10 = vld [vmem:[#allocation6 + $0x8] sm:$0xff] }
  0x12   :  { %v353_v11 = vld [vmem:[#allocation6] sm:$0xff]  ;;  %v352_v12 = vld [vmem:[#allocation3] sm:$0xff]  ;;  %v363_v14 = vld [vmem:[#allocation8 + $0x10] sm:$0xff] }
  0x13   :  { %151 = vmatpush.bf16.msra.mxu0 %v359_v1  ;;  %v364_v13 = vld [vmem:[#allocation8 + $0x18] sm:$0xff]  ;;  %v362_v15 = vld [vmem:[#allocation8 + $0x8] sm:$0xff]  ;;  %v361_v16 = vld [vmem:[#allocation8] sm:$0xff] }
  0x14   :  { %234 = vmatpush.bf16.msra.mxu1 %v367_v3  ;;  %v377_v18 = vld [vmem:[%s539_s2] ss:$0 sm:$0xff]  ;;  %s270_s2 = sshll.u32 %s542_s5, 4  ;;  %s271_s2 = int_to_ptr.hbm [resolvable:$true] %s270_s2 }
  0x15   :  { %v378_v25 = vld [vmem:[%s541_s4] ss:$0 sm:$0xff] }
  0x17   :  { %152 = vmatpush.bf16.msra.mxu0 %v358_v4 }
  0x18   :  { %235 = vmatpush.bf16.msra.mxu1 %v366_v5 }
  0x1b   :  { %153 = vmatpush.bf16.msra.mxu0 %v357_v6 }
  0x1c   :  { %236 = vmatpush.bf16.msra.mxu1 %v365_v7 }
  0x1f   :  { %154 = vmatpush.bf16.msra.mxu0 %v356_v8 }
  0x20   :  { %237 = vmatpush.bf16.msra.mxu1 %v364_v13 }
  0x23   :  { %155 = vmatpush.bf16.msra.mxu0 %v355_v9 }
  0x24   :  { %238 = vmatpush.bf16.msra.mxu1 %v363_v14 }
  0x27   :  { %156 = vmatpush.bf16.msra.mxu0 %v354_v10 }
  0x28   :  { %239 = vmatpush.bf16.msra.mxu1 %v362_v15 }
  0x2b   :  { %157 = vmatpush.bf16.msra.mxu0 %v353_v11 }
  0x2c   :  { %240 = vmatpush.bf16.msra.mxu1 %v361_v16 }
  0x2e   :  { %158 = vmatmul.bf16.vlgmr.msra.gmra.mxu0 %v352_v12 }
  0xab   :  { %v159_v17 = vpop.f32.mrf.mxu0 }
  0xac   :  { %v160_v19 = vadd.f32 %v377_v18, %v159_v17 }
  0xae   :  { %v164_v22 = vmax.f32 %v160_v19, 0.0 }
  0xb3   :  { %v161_v20 = vpop.f32.mrf.mxu0 }
  0xb4   :  { %v162_v21 = vadd.f32 %v377_v18, %v161_v20 }
  0xb6   :  { %v165_v23 = vmax.f32 %v162_v21, 0.0 }
  0xb8   :  { %v168_v24 = vpack.c.bf16 %v165_v23, %v164_v22 }
  0xba   :  { %241 = vmatmul.bf16.vlgmr.msra.gmra.mxu1 %v168_v24 }
 0x137   :  { %v242_v26 = vpop.f32.mrf.mxu1 }
 0x138   :  { %v260_v27 = vadd.f32 %v378_v25, %v242_v26 }
 0x13a   :  { %262 = vst [vmem:[#allocation9] sm:$0xff] %v260_v27 }
 0x13f   :  { %v244_v28 = vpop.f32.mrf.mxu1 }
 0x140   :  { %v261_v29 = vadd.f32 %v378_v25, %v244_v28 }
 0x142   :  { %263 = vst [vmem:[#allocation9 + $0x8] sm:$0xff] %v261_v29 }
 0x143   :  { %276 = dma.vmem_to_hbm [thread:$0]  %s269_s12, 256, %s271_s2, [#allocation5], %s487_s15, %s487_s15, %s488_s16  }
 0x144   :  { %479 = dma.done.wait [#allocation5], 256  }
 0x145   :  { %480 = vsyncadd [#allocation5], 4294967040 }
 0x146   :  { %281 = vsyncpa [#allocation4], 1 }
 0x147   :  { %282 = vsyncpa [#allocation7], 1 }
 0x148   :  { %283 = vsyncpa [#allocation5], 1 }

</bundles_post_ra>
